<compile_context>
chip_gen: v6e
topology: v6e:2x2x1
jax: 0.10.0
libtpu: 0.0.40
codegen_flags: <defaults>
</compile_context>

<pallas_src>
import math
import jax
import jax.numpy as jnp
from jax.experimental import pallas as pl
from jax.experimental.pallas import tpu as pltpu


# --------------------------------------------------------------------------
# Fused linear (x @ W + b) kernel -- used for the fused QKV projection.
# --------------------------------------------------------------------------
def _linear_bias_kernel(x_ref, w_ref, b_ref, o_ref):
    o_ref[...] = (jnp.dot(x_ref[...], w_ref[...],
                          preferred_element_type=jnp.float32)
                  + b_ref[...]).astype(o_ref.dtype)


def pallas_linear(x, w, b):
    # x: (M, K), w: (K, N), b: (N,) -> (M, N)
    M, K = x.shape
    N = w.shape[1]
    return pl.pallas_call(
        _linear_bias_kernel,
        out_shape=jax.ShapeDtypeStruct((M, N), jnp.float32),
        grid=(1,),
        in_specs=[pl.BlockSpec((M, K), lambda i: (0, 0)),
                  pl.BlockSpec((K, N), lambda i: (0, 0)),
                  pl.BlockSpec((1, N), lambda i: (0, 0))],
        out_specs=pl.BlockSpec((M, N), lambda i: (0, 0)),
    )(x, w, b.reshape(1, N))


# --------------------------------------------------------------------------
# Fused output-projection + residual + LayerNorm kernel.
#   y = LayerNorm(resid + ctx @ Wo + bo)
# --------------------------------------------------------------------------
def _proj_residual_ln_kernel(ctx_ref, res_ref, w_ref, b_ref, g_ref, beta_ref, o_ref):
    y = (jnp.dot(ctx_ref[...], w_ref[...], preferred_element_type=jnp.float32)
         + b_ref[...] + res_ref[...])
    mu = jnp.mean(y, axis=-1, keepdims=True)
    var = jnp.mean((y - mu) ** 2, axis=-1, keepdims=True)
    y = (y - mu) * jax.lax.rsqrt(var + 1e-12) * g_ref[...] + beta_ref[...]
    o_ref[...] = y.astype(o_ref.dtype)


def pallas_attn_out_ln(ctx, resid, wo, bo, g, beta):
    M, H = ctx.shape
    return pl.pallas_call(
        _proj_residual_ln_kernel,
        out_shape=jax.ShapeDtypeStruct((M, H), jnp.float32),
        grid=(1,),
        in_specs=[pl.BlockSpec((M, H), lambda i: (0, 0)),
                  pl.BlockSpec((M, H), lambda i: (0, 0)),
                  pl.BlockSpec((H, H), lambda i: (0, 0)),
                  pl.BlockSpec((1, H), lambda i: (0, 0)),
                  pl.BlockSpec((1, H), lambda i: (0, 0)),
                  pl.BlockSpec((1, H), lambda i: (0, 0))],
        out_specs=pl.BlockSpec((M, H), lambda i: (0, 0)),
    )(ctx, resid, wo, bo.reshape(1, H), g.reshape(1, H), beta.reshape(1, H))


# --------------------------------------------------------------------------
# Fused FFN + residual + LayerNorm kernel.
#   y = LayerNorm(x + gelu(x @ W1 + b1) @ W2 + b2)
# (tanh-approx GELU; synthetic encoder so the approximation choice is free)
# --------------------------------------------------------------------------
_GELU_C = math.sqrt(2.0 / math.pi)


def _ffn_residual_ln_kernel(x_ref, w1_ref, b1_ref, w2_ref, b2_ref,
                            g_ref, beta_ref, o_ref):
    x = x_ref[...]
    h1 = (jnp.dot(x, w1_ref[...], preferred_element_type=jnp.float32)
          + b1_ref[...])
    h1 = 0.5 * h1 * (1.0 + jnp.tanh(_GELU_C * (h1 + 0.044715 * h1 * h1 * h1)))
    y = (jnp.dot(h1, w2_ref[...], preferred_element_type=jnp.float32)
         + b2_ref[...] + x)
    mu = jnp.mean(y, axis=-1, keepdims=True)
    var = jnp.mean((y - mu) ** 2, axis=-1, keepdims=True)
    y = (y - mu) * jax.lax.rsqrt(var + 1e-12) * g_ref[...] + beta_ref[...]
    o_ref[...] = y.astype(o_ref.dtype)


def pallas_ffn_ln(x, w1, b1, w2, b2, g, beta):
    M, H = x.shape
    FF = w1.shape[1]
    return pl.pallas_call(
        _ffn_residual_ln_kernel,
        out_shape=jax.ShapeDtypeStruct((M, H), jnp.float32),
        grid=(1,),
        in_specs=[pl.BlockSpec((M, H), lambda i: (0, 0)),
                  pl.BlockSpec((H, FF), lambda i: (0, 0)),
                  pl.BlockSpec((1, FF), lambda i: (0, 0)),
                  pl.BlockSpec((FF, H), lambda i: (0, 0)),
                  pl.BlockSpec((1, H), lambda i: (0, 0)),
                  pl.BlockSpec((1, H), lambda i: (0, 0)),
                  pl.BlockSpec((1, H), lambda i: (0, 0))],
        out_specs=pl.BlockSpec((M, H), lambda i: (0, 0)),
    )(x, w1, b1.reshape(1, FF), w2, b2.reshape(1, H),
      g.reshape(1, H), beta.reshape(1, H))


# --------------------------------------------------------------------------
# Bert_basic head path -- ONE kernel, ONE grid step, all L layers resident:
#   for each layer l (batched einsum):
#     x      = cls_hidden[l]                     (dropout = identity, eval)
#     h      = tanh(x @ Wd[l] + bd[l])
#     logits = h @ Wp[l] + bp[l]
#   loss = sum_l mean_batch( cross_entropy(logits_l, label) )
# Labels enter as int32 in SMEM; the one-hot is built in-kernel.
# --------------------------------------------------------------------------
def _head_loss_kernel(lab_ref, cls_ref, wd_ref, bd_ref, wp_ref, bp_ref, loss_ref):
    L, B, H = cls_ref.shape
    C = wp_ref.shape[-1]

    x = cls_ref[...]                                                    # (L,B,H)
    h = jnp.tanh(
        jnp.einsum("lbh,lhk->lbk", x, wd_ref[...],
                   preferred_element_type=jnp.float32) + bd_ref[...])   # (L,B,H)
    logits = (jnp.einsum("lbk,lkc->lbc", h, wp_ref[...],
                         preferred_element_type=jnp.float32)
              + bp_ref[...])                                            # (L,B,C)

    # numerically-stable log-softmax; logits never leave VMEM (no C=3 store)
    m = jnp.max(logits, axis=-1, keepdims=True)
    z = logits - m
    lse = jnp.log(jnp.sum(jnp.exp(z), axis=-1, keepdims=True))
    logp = z - lse                                                      # (L,B,C)

    # one-hot built in-kernel from SMEM integer labels
    iota_c = jax.lax.broadcasted_iota(jnp.int32, (L, B, C), 2)
    iota_b = jax.lax.broadcasted_iota(jnp.int32, (L, B, C), 1)
    onehot = jnp.zeros((L, B, C), jnp.float32)
    for b in range(B):                       # B is tiny and static
        t = lab_ref[b]
        onehot = onehot + jnp.where((iota_b == b) & (iota_c == t), 1.0, 0.0)

    nll_sum = -jnp.sum(onehot * logp)        # sums over layers and batch
    loss_ref[...] = nll_sum * (1.0 / B) + jnp.zeros((1, 1), jnp.float32)


def bert_basic_head_loss(cls_stack, Wd, bd, Wp, bp, labels):
    # cls_stack: (L,B,H), Wd: (L,H,H), bd: (L,H), Wp: (L,H,C), bp: (L,C), labels: (B,)
    L, B, H = cls_stack.shape
    C = Wp.shape[-1]
    out = pl.pallas_call(
        _head_loss_kernel,
        out_shape=jax.ShapeDtypeStruct((1, 1), jnp.float32),
        grid=(1,),
        in_specs=[pl.BlockSpec(memory_space=pltpu.MemorySpace.SMEM),   # labels
                  pl.BlockSpec((L, B, H), lambda i: (0, 0, 0)),
                  pl.BlockSpec((L, H, H), lambda i: (0, 0, 0)),
                  pl.BlockSpec((L, 1, H), lambda i: (0, 0, 0)),
                  pl.BlockSpec((L, H, C), lambda i: (0, 0, 0)),
                  pl.BlockSpec((L, 1, C), lambda i: (0, 0, 0))],
        out_specs=pl.BlockSpec((1, 1), lambda i: (0, 0)),
    )(labels.astype(jnp.int32), cls_stack, Wd,
      bd.reshape(L, 1, H), Wp, bp.reshape(L, 1, C))
    return out[0, 0]


# --------------------------------------------------------------------------
# Synthetic BERT encoder.  Heavy projections run through fused Pallas kernels;
# attention softmax / head einsums are left to XLA (tiny shapes, XLA fuses
# them; extra pallas_call boundaries would only add launch + HBM round-trips).
# --------------------------------------------------------------------------
def layer_norm(x, g, b, eps=1e-12):
    mu = jnp.mean(x, axis=-1, keepdims=True)
    var = jnp.mean((x - mu) ** 2, axis=-1, keepdims=True)
    return (x - mu) / jnp.sqrt(var + eps) * g + b


def encoder_layer(h, mask_bias, p, num_heads):
    B, S, H = h.shape
    hd = H // num_heads
    M = B * S
    h2 = h.reshape(M, H)

    # fused Q|K|V projection (single pallas_call, lane-dense N = 3H)
    qkv = pallas_linear(h2, p["wqkv"], p["bqkv"])                  # (M, 3H)
    q, k, v = jnp.split(qkv, 3, axis=-1)
    q = q.reshape(B, S, num_heads, hd)
    k = k.reshape(B, S, num_heads, hd)
    v = v.reshape(B, S, num_heads, hd)

    scores = jnp.einsum("bqhd,bkhd->bhqk", q, k) / math.sqrt(hd) + mask_bias
    probs = jax.nn.softmax(scores, axis=-1)
    ctx = jnp.einsum("bhqk,bkhd->bqhd", probs, v).reshape(M, H)

    # fused: output projection + residual + LayerNorm
    h2 = pallas_attn_out_ln(ctx, h2, p["wo"], p["bo"], p["ln1_g"], p["ln1_b"])
    # fused: FFN (matmul+bias+GELU+matmul+bias) + residual + LayerNorm
    h2 = pallas_ffn_ln(h2, p["w1"], p["b1"], p["w2"], p["b2"],
                       p["ln2_g"], p["ln2_b"])
    return h2.reshape(B, S, H)


def encoder_forward(input_ids, attention_mask, token_type_ids, params):
    emb = (params["word_emb"][input_ids]
           + params["pos_emb"][None, :input_ids.shape[1], :]
           + params["type_emb"][token_type_ids])
    h = layer_norm(emb, params["emb_ln_g"], params["emb_ln_b"])
    hiddens = [h]
    mask_bias = (1.0 - attention_mask.astype(jnp.float32))[:, None, None, :] * -1e9
    for lp in params["layers"]:
        h = encoder_layer(h, mask_bias, lp, params["num_heads"])
        hiddens.append(h)
    return hiddens


# --------------------------------------------------------------------------
# Deterministic parameter construction
# --------------------------------------------------------------------------
def init_params(key, vocab, max_pos, H, FF, L, C, num_heads):
    def nrm(k, shape, scale=0.02):
        return scale * jax.random.normal(k, shape, dtype=jnp.float32)

    keys = jax.random.split(key, 8 + L)
    params = {
        "num_heads": num_heads,
        "word_emb": nrm(keys[0], (vocab, H)),
        "pos_emb": nrm(keys[1], (max_pos, H)),
        "type_emb": nrm(keys[2], (2, H)),
        "emb_ln_g": jnp.ones((H,), jnp.float32),
        "emb_ln_b": jnp.zeros((H,), jnp.float32),
        "layers": [],
    }
    for l in range(L):
        ks = jax.random.split(keys[8 + l], 8)
        params["layers"].append({
            # fused Q|K|V weights: (H, 3H), biases (3H,)
            "wqkv": nrm(ks[0], (H, 3 * H)), "bqkv": jnp.zeros((3 * H,), jnp.float32),
            "wo": nrm(ks[3], (H, H)), "bo": jnp.zeros((H,), jnp.float32),
            "w1": nrm(ks[4], (H, FF)), "b1": jnp.zeros((FF,), jnp.float32),
            "w2": nrm(ks[5], (FF, H)), "b2": jnp.zeros((H,), jnp.float32),
            "ln1_g": jnp.ones((H,), jnp.float32), "ln1_b": jnp.zeros((H,), jnp.float32),
            "ln2_g": jnp.ones((H,), jnp.float32), "ln2_b": jnp.zeros((H,), jnp.float32),
        })
    # per-layer head params (denses + predictions of Bert_basic)
    kd, kp = jax.random.split(keys[3])
    Wd = 0.02 * jax.random.normal(kd, (L, H, H), dtype=jnp.float32)
    bd = jnp.zeros((L, H), jnp.float32)
    Wp = 0.02 * jax.random.normal(kp, (L, H, C), dtype=jnp.float32)
    bp = jnp.zeros((L, C), jnp.float32)
    return params, (Wd, bd, Wp, bp)


# --------------------------------------------------------------------------
# Full Bert_basic forward (label is not None branch -> summed CE loss)
# --------------------------------------------------------------------------
def bert_basic_forward(inputs, enc_params, head_params, split_layers):
    seq, label, attention_mask, token_type_ids = inputs
    Wd, bd, Wp, bp = head_params
    L = len(enc_params["layers"])

    hiddens = encoder_forward(seq, attention_mask, token_type_ids, enc_params)
    if split_layers == L:
        hidden_list = hiddens[1:]
    else:
        assert L % split_layers == 0
        hidden_list = [hiddens[(1 + l) * (L // split_layers)]
                       for l in range(split_layers)]

    # CLS token of every selected hidden state -> (split_layers, B, H)
    cls_stack = jnp.stack([h[:, 0, :] for h in hidden_list], axis=0)

    # NOTE: dropout is identity (eval mode); training-mode stochastic dropout
    # would use pltpu.prng_seed / pltpu.stateful_bernoulli inside the kernel.
    # TODO(synk): cast matmul operands to bf16 (f32 accum) once H >= 256.
    return bert_basic_head_loss(cls_stack[:split_layers],
                                Wd[:split_layers], bd[:split_layers],
                                Wp[:split_layers], bp[:split_layers],
                                label)


def reference_head_loss(cls_stack, Wd, bd, Wp, bp, label):
    # plain-JAX reference of the head path for a correctness check
    losses = []
    for l in range(cls_stack.shape[0]):
        x = jnp.tanh(cls_stack[l] @ Wd[l] + bd[l])
        logits = x @ Wp[l] + bp[l]
        logp = jax.nn.log_softmax(logits, axis=-1)
        nll = -jnp.take_along_axis(logp, label[:, None], axis=-1)[:, 0]
        losses.append(jnp.mean(nll))
    return sum(losses)


if __name__ == "__main__":
    # small shapes
    B, S, H, FF, L, C, HEADS, VOCAB, MAXPOS = 2, 8, 32, 64, 4, 3, 4, 50, 64
    SPLIT_LAYERS = L  # matches the `split_layers == layers` branch

    key = jax.random.PRNGKey(0)
    k_par, k_ids, k_tok, k_lab = jax.random.split(key, 4)

    enc_params, head_params = init_params(k_par, VOCAB, MAXPOS, H, FF, L, C, HEADS)

    seq = jax.random.randint(k_ids, (B, S), 0, VOCAB, dtype=jnp.int32)
    attention_mask = jnp.ones((B, S), dtype=jnp.int32)
    token_type_ids = jax.random.randint(k_tok, (B, S), 0, 2, dtype=jnp.int32)
    label = jax.random.randint(k_lab, (B,), 0, C, dtype=jnp.int32)

    inputs = (seq, label, attention_mask, token_type_ids)
    loss = bert_basic_forward(inputs, enc_params, head_params, SPLIT_LAYERS)
    loss = jax.block_until_ready(loss)

    # sanity check of the Pallas head kernel against a plain-JAX reference
    hiddens = encoder_forward(seq, attention_mask, token_type_ids, enc_params)
    cls_stack = jnp.stack([h[:, 0, :] for h in hiddens[1:]], axis=0)
    Wd, bd, Wp, bp = head_params
    ref = reference_head_loss(cls_stack, Wd, bd, Wp, bp, label)
    assert jnp.allclose(loss, ref, rtol=1e-3, atol=1e-4), (loss, ref)

    print("KERNEL_OK")
</pallas_src>

<mosaic_0001>
module attributes {stable_mosaic.version = 11 : i64} {
  func.func @_linear_bias_kernel(%arg0: i32, %arg1: memref<16x32xf32, #tpu.memory_space<vmem>>, %arg2: memref<32x96xf32, #tpu.memory_space<vmem>>, %arg3: memref<1x96xf32, #tpu.memory_space<vmem>>, %arg4: memref<16x96xf32, #tpu.memory_space<vmem>>) attributes {dimension_semantics = [#tpu.dimension_semantics<arbitrary>], iteration_bounds = array<i64: 1>, scalar_prefetch = 0 : i64, scratch_operands = 0 : i64, tpu.core_type = #tpu.core_type<tc>, window_params = [{pipeline_mode = #tpu.pipeline_mode<synchronous>, transform_indices = @transform_0, window_bounds = array<i64: 16, 32>}, {pipeline_mode = #tpu.pipeline_mode<synchronous>, transform_indices = @transform_1, window_bounds = array<i64: 32, 96>}, {pipeline_mode = #tpu.pipeline_mode<synchronous>, transform_indices = @transform_2, window_bounds = array<i64: 1, 96>}, {pipeline_mode = #tpu.pipeline_mode<synchronous>, transform_indices = @transform_3, window_bounds = array<i64: 16, 96>}]} {
    %c0 = arith.constant 0 : index
    %c0_0 = arith.constant 0 : index
    %0 = vector.load %arg1[%c0, %c0_0] : memref<16x32xf32, #tpu.memory_space<vmem>>, vector<16x32xf32>
    %c0_1 = arith.constant 0 : index
    %c0_2 = arith.constant 0 : index
    %1 = vector.load %arg2[%c0_1, %c0_2] : memref<32x96xf32, #tpu.memory_space<vmem>>, vector<32x96xf32>
    %cst = arith.constant dense<0.000000e+00> : vector<16x96xf32>
    %2 = tpu.matmul %0, %1, %cst {dimension_numbers = #tpu.dot_dimension_numbers<[1], [0], [0], [1], [0, 0, 1, 1], [], []>} : vector<16x32xf32>, vector<32x96xf32>, vector<16x96xf32> -> vector<16x96xf32>
    %c0_3 = arith.constant 0 : index
    %c0_4 = arith.constant 0 : index
    %3 = vector.load %arg3[%c0_3, %c0_4] : memref<1x96xf32, #tpu.memory_space<vmem>>, vector<1x96xf32>
    %4 = vector.broadcast %3 : vector<1x96xf32> to vector<16x96xf32>
    %5 = arith.addf %2, %4 : vector<16x96xf32>
    %c0_5 = arith.constant 0 : index
    %c0_6 = arith.constant 0 : index
    %6 = vector.load %arg4[%c0_5, %c0_6] : memref<16x96xf32, #tpu.memory_space<vmem>>, vector<16x96xf32>
    tpu.vector_store %arg4[%c0_5, %c0_6], %5 {strides = array<i32>} : memref<16x96xf32, #tpu.memory_space<vmem>>, vector<16x96xf32>,
    return
  }
  func.func @transform_0(%arg0: i32) -> (i32, i32) {
    %c0_i32 = arith.constant 0 : i32
    %c0_i32_0 = arith.constant 0 : i32
    %c0_i32_1 = arith.constant 0 : i32
    return %c0_i32, %c0_i32_0 : i32, i32
  }
  func.func @transform_1(%arg0: i32) -> (i32, i32) {
    %c0_i32 = arith.constant 0 : i32
    %c0_i32_0 = arith.constant 0 : i32
    %c0_i32_1 = arith.constant 0 : i32
    return %c0_i32, %c0_i32_0 : i32, i32
  }
  func.func @transform_2(%arg0: i32) -> (i32, i32) {
    %c0_i32 = arith.constant 0 : i32
    %c0_i32_0 = arith.constant 0 : i32
    %c0_i32_1 = arith.constant 0 : i32
    return %c0_i32, %c0_i32_0 : i32, i32
  }
  func.func @transform_3(%arg0: i32) -> (i32, i32) {
    %c0_i32 = arith.constant 0 : i32
    %c0_i32_0 = arith.constant 0 : i32
    %c0_i32_1 = arith.constant 0 : i32
    return %c0_i32, %c0_i32_0 : i32, i32
  }
}

</mosaic_0001>

<bundles_post_ra>
// kernel: tpu_custom_call.1
= control target key start
LH: loop header
LB: loop body
LE: loop exit
PB: predicated region body
PF: predicated region fallthrough
CT: control target
= control target key end

     0   :  { %8 = vsyncpa [#allocation3], 0  ;;  %s298_s0 = inlined_call_operand.hbm [shape: f32[16,32], index: 0, kind: input, shape index: {}]   ;;  %s299_s1 = inlined_call_operand.hbm [shape: f32[32,96], index: 1, kind: input, shape index: {}]   ;;  %s300_s2 = inlined_call_operand.vmem [shape: f32[1,96], index: 2, kind: input, shape index: {}]   ;;  %s301_s3 = inlined_call_operand.hbm [shape: f32[16,96], index: 3, kind: output, shape index: {}]  }
   0x1   :  { %9 = vsyncpa [#allocation6], 0 }
   0x2   :  { %10 = vsyncpa [#allocation4], 0  ;;  %s250_s12 = smov [#allocation2]  }
   0x3   :  { %s16_s13 = sshll.u32 %s250_s12, 4  ;;  %s17_s13 = int_to_ptr.vmem [resolvable:$true] %s16_s13 }
   0x4   :  { %s192_s14 = scalar_lea.vmem %s17_s13, 256  ;;  %p197_p1 = scmp.lt.s32.totalorder %s17_s13, %s17_s13 }
   0x5   :  { %p193_p0 = scmp.ne.s32.totalorder %s17_s13, %s192_s14  ;;  %p198_p2 = scmp.lt.s32.totalorder %s192_s14, %s192_s14 }
   0x7   :  { %p199_p3 = por %p198_p2, %p197_p1 }
   0x9   :  { %p200_p4 = pnand %p199_p3, %p193_p0 }
   0xb   :  { %203 = shalt.err (!%p200_p4)
}
   0xc   :  { %s251_s15 = smov 128   ;;  %s252_s16 = smov 8  }
   0xd   :  { %22 = dma.hbm_to_vmem [thread:$0]  %s298_s0, 256, %s17_s13, [#allocation3], %s251_s15, %s251_s15, %s252_s16  }
   0xe   :  { %s253_s19 = smov [#allocation5]  }
   0xf   :  { %s28_s20 = sshll.u32 %s253_s19, 4  ;;  %s29_s20 = int_to_ptr.vmem [resolvable:$true] %s28_s20 }
  0x10   :  { %s212_s21 = scalar_lea.vmem %s29_s20, 512  ;;  %p217_p6 = scmp.lt.s32.totalorder %s29_s20, %s29_s20 }
  0x11   :  { %p213_p5 = scmp.ne.s32.totalorder %s29_s20, %s212_s21  ;;  %p218_p7 = scmp.lt.s32.totalorder %s212_s21, %s212_s21 }
  0x13   :  { %p219_p8 = por %p218_p7, %p217_p6 }
  0x15   :  { %p220_p9 = pnand %p219_p8, %p213_p5 }
  0x17   :  { %223 = shalt.err (!%p220_p9)
}
  0x18   :  { %34 = dma.hbm_to_vmem [thread:$0]  %s299_s1, 512, %s29_s20, [#allocation6], %s251_s15, %s251_s15, %s252_s16  }
  0x19   :  { %244 = dma.done.wait [#allocation3], 256  }
  0x1a   :  { %245 = vsyncadd [#allocation3], 4294967040 }
  0x1b   :  { %246 = dma.done.wait [#allocation6], 512  }
  0x1c   :  { %247 = vsyncadd [#allocation6], 4294966784  ;;  %vm56_vm0 = vcmask 261120   ;;  %v48_v0 = vld [vmem:[#allocation5 + $0x18] sm:$0xff]  ;;  %v47_v1 = vld [vmem:[#allocation5 + $0x10] sm:$0xff]  ;;  %vm138_vm1 = vcmask 785408  }
  0x1d   :  { %168 = vmatprep.subr.mxu0 %v48_v0  ;;  %v43_v2 = vld [vmem:[#allocation2] sm:$0xff]  ;;  %v46_v3 = vld [vmem:[#allocation5 + $0x8] sm:$0xff]  ;;  %v45_v4 = vld [vmem:[#allocation5] sm:$0xff]  ;;  %s254_s24 = smov [#allocation7]  }
  0x1e   :  { %169 = vmatpush3.msra.mxu0 %v48_v0  ;;  %176 = vmatprep.mubr.msk.f32.mxu0 %vm56_vm0, %v43_v2  ;;  %v44_v5 = vld [vmem:[#allocation2 + $0x8] sm:$0xff]  ;;  %v159_v6 = vld [vmem:[%s300_s2] ss:$0 sm:$0xff]  ;;  %s146_s25 = sshll.u32 %s254_s24, 4  ;;  %s147_s25 = int_to_ptr.vmem [resolvable:$true] %s146_s25 }
  0x1f   :  { %170 = vmatprep.subr.mxu0 %v47_v1  ;;  %s224_s26 = scalar_lea.vmem %s147_s25, 256  ;;  %p229_p11 = scmp.lt.s32.totalorder %s147_s25, %s147_s25 }
  0x20   :  { %171 = vmatpush3.msra.mxu0 %v47_v1  ;;  %p225_p10 = scmp.ne.s32.totalorder %s147_s25, %s224_s26  ;;  %p230_p12 = scmp.lt.s32.totalorder %s224_s26, %s224_s26 }
  0x21   :  { %172 = vmatprep.subr.mxu0 %v46_v3 }
  0x22   :  { %173 = vmatpush3.msra.mxu0 %v46_v3  ;;  %p231_p13 = por %p230_p12, %p229_p11 }
  0x23   :  { %174 = vmatprep.subr.mxu0 %v45_v4 }
  0x24   :  { %175 = vmatpush3.msra.mxu0 %v45_v4  ;;  %p232_p0 = pnand %p231_p13, %p225_p10 }
  0x25   :  { %177 = vmatmul.mubr.msk.f32.vlgmr.msra.gmra.mxu0 %vm56_vm0, %v44_v5 }
  0xe5   :  { %v178_v7 = vpop.f32.mrf.mxu0 }
  0xe6   :  { %v135_v8 = vadd.f32 %v178_v7, %v159_v6 }
  0xe7   :  { %v129_v9 = vpop.f32.mrf.mxu0 }
  0xe8   :  { %v130_v10 = vadd.f32 %v159_v6, %v129_v9  ;;  %140 = vst.msk [vmem:[#allocation7 + $0x8] sm:$0xff] %vm138_vm1, %v135_v8 }
  0xea   :  { %139 = vst.msk [vmem:[#allocation7] sm:$0xff] %vm138_vm1, %v130_v10 }
  0xeb   :  { %235 = shalt.err (!%p232_p0)
}
  0xec   :  { %152 = dma.vmem_to_hbm [thread:$0]  %s147_s25, 256, %s301_s3, [#allocation4], %s251_s15, %s251_s15, %s252_s16  }
  0xed   :  { %248 = dma.done.wait [#allocation4], 256  }
  0xee   :  { %249 = vsyncadd [#allocation4], 4294967040 }
  0xef   :  { %156 = vsyncpa [#allocation3], 1 }
  0xf0   :  { %157 = vsyncpa [#allocation6], 1 }
  0xf1   :  { %158 = vsyncpa [#allocation4], 1 }

</bundles_post_ra>
